<compile_context>
chip_gen: v7x
topology: tpu7x:2x2x1
jax: 0.10.0
libtpu: 0.0.40
codegen_flags: <defaults>
</compile_context>

<pallas_src>
import jax
import jax.numpy as jnp
from jax.experimental import pallas as pl
from jax.experimental.pallas import tpu as pltpu

LANE = 128                            # TPU vreg lane width
TARGET_BLOCK_BYTES = 2 * 1024 * 1024  # ~2 MiB per pipelined block


def _swish_kernel(x_ref, o_ref):
    x = x_ref[...].astype(jnp.float32)
    # sigmoid lowers to EUP (exp + reciprocal); multiply runs on the VPU.
    o_ref[...] = (x * jax.nn.sigmoid(x)).astype(o_ref.dtype)


def _sublane_multiple(dtype) -> int:
    # Sublane packing granularity: 8 rows (32-bit), 16 (16-bit), 32 (8-bit).
    return {4: 8, 2: 16, 1: 32}.get(jnp.dtype(dtype).itemsize, 8)


@jax.jit
def swish(x: jax.Array) -> jax.Array:
    """Apply Swish element-wise with a Pallas TPU kernel. Preserves shape/dtype."""
    orig_shape = x.shape
    orig_dtype = x.dtype
    n = x.size
    if n == 0:
        return x

    flat = x.reshape(-1)

    # Tiny pad only if n is not a multiple of the lane width (<= 127 elements).
    n_pad = (-n) % LANE
    if n_pad:
        flat = jnp.pad(flat, (0, n_pad))
    n_padded = n + n_pad

    # Pick the widest lane-dense last dim W (multiple of 128 dividing the flat
    # length) while keeping at least 8 sublane rows.
    w = LANE
    for cand in (4096, 2048, 1024, 512, 256):
        if n_padded % cand == 0 and n_padded // cand >= 8:
            w = cand
            break
    rows = n_padded // w
    x2d = flat.reshape(rows, w)

    # ~2 MiB blocks spanning the full last dim (each block is one contiguous
    # HBM chunk). row_tile is a sublane multiple, or the full row extent when
    # the array is smaller than one tile (full-extent blocks are always legal).
    itemsize = jnp.dtype(orig_dtype).itemsize
    sub = _sublane_multiple(orig_dtype)
    row_tile = max(sub, (TARGET_BLOCK_BYTES // (w * itemsize)) // sub * sub)
    row_tile = min(row_tile, rows)

    grid = (pl.cdiv(rows, row_tile),)  # partial last block handled by masking

    out2d = pl.pallas_call(
        _swish_kernel,
        out_shape=jax.ShapeDtypeStruct((rows, w), orig_dtype),
        grid_spec=pltpu.PrefetchScalarGridSpec(
            num_scalar_prefetch=0,
            grid=grid,
            in_specs=[pl.BlockSpec((row_tile, w), lambda i: (i, 0))],
            out_specs=pl.BlockSpec((row_tile, w), lambda i: (i, 0)),
        ),
        compiler_params=pltpu.CompilerParams(
            dimension_semantics=("parallel",),  # shard blocks across v7x's 2 TCs
        ),
    )(x2d)

    out_flat = out2d.reshape(-1)
    if n_pad:
        out_flat = out_flat[:n]
    return out_flat.reshape(orig_shape)


if __name__ == "__main__":
    key = jax.random.PRNGKey(0)
    # NCHW input, matching the PyTorch module's typical use.
    x = jax.random.normal(key, (2, 4, 16, 16), dtype=jnp.float32)

    y = swish(x)
    jax.block_until_ready(y)

    # Reference check against plain-JAX swish.
    y_ref = x * jax.nn.sigmoid(x)
    assert y.shape == x.shape and y.dtype == x.dtype
    assert jnp.allclose(y, y_ref, atol=1e-6, rtol=1e-5)

    print("KERNEL_OK")
</pallas_src>

<mosaic_0001>
module attributes {stable_mosaic.version = 11 : i64} {
  func.func @_swish_kernel(%arg0: i32, %arg1: memref<8x256xf32, #tpu.memory_space<vmem>>, %arg2: memref<8x256xf32, #tpu.memory_space<vmem>>) attributes {dimension_semantics = [#tpu.dimension_semantics<parallel>], iteration_bounds = array<i64: 1>, scalar_prefetch = 0 : i64, scratch_operands = 0 : i64, tpu.core_type = #tpu.core_type<tc>, window_params = [{transform_indices = @transform_0, window_bounds = array<i64: 8, 256>}, {transform_indices = @transform_1, window_bounds = array<i64: 8, 256>}]} {
    %c0 = arith.constant 0 : index
    %c0_0 = arith.constant 0 : index
    %0 = vector.load %arg1[%c0, %c0_0] : memref<8x256xf32, #tpu.memory_space<vmem>>, vector<8x256xf32>
    %1 = arith.negf %0 : vector<8x256xf32>
    %2 = math.exp %1 : vector<8x256xf32>
    %cst = arith.constant 1.000000e+00 : f32
    %3 = vector.broadcast %cst : f32 to vector<8x256xf32>
    %4 = arith.addf %3, %2 : vector<8x256xf32>
    %5 = arith.divf %3, %4 : vector<8x256xf32>
    %6 = arith.mulf %0, %5 : vector<8x256xf32>
    %c0_1 = arith.constant 0 : index
    %c0_2 = arith.constant 0 : index
    %7 = vector.load %arg2[%c0_1, %c0_2] : memref<8x256xf32, #tpu.memory_space<vmem>>, vector<8x256xf32>
    tpu.vector_store %arg2[%c0_1, %c0_2], %6 {strides = array<i32>} : memref<8x256xf32, #tpu.memory_space<vmem>>, vector<8x256xf32>,
    return
  }
  func.func @transform_0(%arg0: i32) -> (i32, i32) {
    %c0_i32 = arith.constant 0 : i32
    %c0_i32_0 = arith.constant 0 : i32
    return %arg0, %c0_i32 : i32, i32
  }
  func.func @transform_1(%arg0: i32) -> (i32, i32) {
    %c0_i32 = arith.constant 0 : i32
    %c0_i32_0 = arith.constant 0 : i32
    return %arg0, %c0_i32 : i32, i32
  }
}

</mosaic_0001>

<bundles_post_ra>
// kernel: swish.1
= control target key start
LH: loop header
LB: loop body
LE: loop exit
PB: predicated region body
PF: predicated region fallthrough
CT: control target
= control target key end

     0   :  { %s62_s0 = inlined_call_operand.vmem [shape: f32[8,256], index: 0, kind: input, shape index: {}]   ;;  %s63_s1 = inlined_call_operand.vmem [shape: f32[8,256], index: 1, kind: output, shape index: {}]  }
   0x1   :  { %v8_v0 = vld [vmem:[%s62_s0] sm:$0xff]  ;;  %v9_v1 = vld [vmem:[%s62_s0 + $0x8] sm:$0xff] }
   0x2   :  { %v30_v2 = vmul.f32 -1.442695, %v8_v0  ;;  %v31_v3 = vmul.f32 -1.442695, %v9_v1 }
   0x4   :  { %32 = vpow2.f32 %v30_v2 }
   0x5   :  { %34 = vpow2.f32 %v31_v3 }
   0xe   :  { %v33_v4 = vpop.eup %32 }
   0xf   :  { %v35_v5 = vpop.eup %34  ;;  %v16_v6 = vadd.f32 1.0, %v33_v4 }
  0x10   :  { %v17_v7 = vadd.f32 1.0, %v35_v5 }
  0x11   :  { %36 = vrcp.f32 %v16_v6 }
  0x12   :  { %38 = vrcp.f32 %v17_v7 }
  0x1b   :  { %v37_v8 = vpop.eup %36 }
  0x1c   :  { %v39_v9 = vpop.eup %38  ;;  %v22_v10 = vmul.f32 %v37_v8, %v8_v0 }
  0x1d   :  { %v23_v11 = vmul.f32 %v39_v9, %v9_v1 }
  0x1e   :  { %24 = vst [vmem:[%s63_s1] sm:$0xff] %v22_v10 }
  0x1f   :  { %25 = vst [vmem:[%s63_s1 + $0x8] sm:$0xff] %v23_v11 }

</bundles_post_ra>
